<compile_context>
chip_gen: v7x
topology: tpu7x:2x2x1
jax: 0.10.0
libtpu: 0.0.40
codegen_flags: <defaults>
</compile_context>

<pallas_src>
import functools
import math

import jax
import jax.numpy as jnp
from jax.experimental import pallas as pl
from jax.experimental.pallas import tpu as pltpu


def _round_up(x, m):
    return (x + m - 1) // m * m


def _hash_u32(h):
    """murmur3-style 32-bit finalizer; cheap VPU ops, good avalanche."""
    h = h ^ (h >> 16)
    h = h * jnp.uint32(0x7FEB352D)
    h = h ^ (h >> 15)
    h = h * jnp.uint32(0x846CA68B)
    h = h ^ (h >> 16)
    return h


def _dropout_mask_x2(shape, seed_u32, row_base_u32, salt):
    """Returns a float32 mask of {0.0, 2.0}: p=0.5 dropout with the 1/(1-p)
    scale folded in.  Keyed on (seed, layer salt, global row, col) so every
    grid tile and every layer draws an independent mask."""
    rows = jax.lax.broadcasted_iota(jnp.int32, shape, 0).astype(jnp.uint32)
    cols = jax.lax.broadcasted_iota(jnp.int32, shape, 1).astype(jnp.uint32)
    rows = rows + row_base_u32
    h = _hash_u32(
        seed_u32
        ^ jnp.uint32(salt)
        ^ (rows * jnp.uint32(0x9E3779B9))
        ^ (cols * jnp.uint32(0x85EBCA6B))
    )
    keep = h >= jnp.uint32(0x80000000)  # probability 0.5
    return jnp.where(keep, jnp.float32(2.0), jnp.float32(0.0))


def _prenet2_kernel(seed_ref, x_ref, w1_ref, b1_ref, w2_ref, b2_ref, o_ref):
    """Fused two-layer prenet on one (TILE_N, Din) row tile."""
    tile_n = x_ref.shape[0]
    seed_u32 = seed_ref[0].astype(jnp.uint32)
    row_base = (pl.program_id(0) * tile_n).astype(jnp.uint32)

    # ---- layer 1: dropout(relu(x @ W1 + b1)) ----  (bf16 MXU, f32 accumulate)
    x = x_ref[...].astype(jnp.bfloat16)
    w1 = w1_ref[...].astype(jnp.bfloat16)
    h = jnp.dot(x, w1, preferred_element_type=jnp.float32) + b1_ref[...]
    h = jnp.maximum(h, 0.0)
    h = h * _dropout_mask_x2(h.shape, seed_u32, row_base, 0x243F6A88)

    # ---- layer 2: dropout(relu(h @ W2 + b2)) ----  (h stays in VMEM/vregs)
    w2 = w2_ref[...].astype(jnp.bfloat16)
    y = jnp.dot(h.astype(jnp.bfloat16), w2,
                preferred_element_type=jnp.float32) + b2_ref[...]
    y = jnp.maximum(y, 0.0)
    y = y * _dropout_mask_x2(y.shape, seed_u32, row_base, 0xB7E15162)

    o_ref[...] = y.astype(o_ref.dtype)


@functools.partial(jax.jit, static_argnames=("tile_n",))
def prenet_forward(x, params, seed, *, tile_n=512):
    """x: (B, T, Din) f32.  params: [(W1, b1), (W2, b2)] with W stored (in, out).
    seed: int32 scalar (runtime), fresh per call.  Returns (B, T, D2) f32."""
    assert len(params) == 2, "fused kernel implements the 2-layer prenet"
    (w1, b1), (w2, b2) = params
    bsz, t, din = x.shape
    d1, d2 = w1.shape[1], w2.shape[1]

    n = bsz * t
    h = x.reshape(n, din)

    # Row tile: big enough to feed the MXU / amortize per-step overhead, but
    # never larger than (padded) N.  Multiple of 8 for sublane alignment.
    tile = min(tile_n, _round_up(n, 8))
    n_pad = _round_up(n, tile)
    if n_pad != n:
        h = jnp.pad(h, ((0, n_pad - n), (0, 0)))

    seed_arr = jnp.asarray(seed, dtype=jnp.int32).reshape(1)

    out = pl.pallas_call(
        _prenet2_kernel,
        out_shape=jax.ShapeDtypeStruct((n_pad, d2), jnp.float32),
        grid_spec=pltpu.PrefetchScalarGridSpec(
            num_scalar_prefetch=1,                      # seed -> SMEM
            grid=(n_pad // tile,),
            in_specs=[
                pl.BlockSpec((tile, din), lambda i, s: (i, 0)),   # x row tile
                pl.BlockSpec((din, d1), lambda i, s: (0, 0)),     # W1 resident
                pl.BlockSpec((1, d1), lambda i, s: (0, 0)),       # b1 resident
                pl.BlockSpec((d1, d2), lambda i, s: (0, 0)),      # W2 resident
                pl.BlockSpec((1, d2), lambda i, s: (0, 0)),       # b2 resident
            ],
            out_specs=pl.BlockSpec((tile, d2), lambda i, s: (i, 0)),
        ),
        compiler_params=pltpu.CompilerParams(
            dimension_semantics=("parallel",),   # shards rows across v7x's 2 TCs
        ),
    )(seed_arr, h, w1, b1.reshape(1, d1), w2, b2.reshape(1, d2))

    return out[:n].reshape(bsz, t, d2)


def init_prenet_params(key, in_features, out_features):
    """Matches the PyTorch module's init.

    Weight: xavier_uniform_ with gain('linear') = 1, stored transposed (in, out).
    Bias:   nn.Linear default, U(-1/sqrt(in), 1/sqrt(in)).
    """
    params = []
    sizes_in = [in_features] + list(out_features[:-1])
    for din, dout in zip(sizes_in, out_features):
        key, kw, kb = jax.random.split(key, 3)
        limit_w = math.sqrt(6.0 / (din + dout))
        w = jax.random.uniform(kw, (din, dout), jnp.float32, -limit_w, limit_w)
        limit_b = 1.0 / math.sqrt(din)
        b = jax.random.uniform(kb, (dout,), jnp.float32, -limit_b, limit_b)
        params.append((w, b))
    return params


if __name__ == "__main__":
    key = jax.random.PRNGKey(0)
    key, kx, kp, ks = jax.random.split(key, 4)

    # Small demo shapes; layer widths kept multiples of 128 (lane-dense stores).
    B, T, IN = 2, 8, 32
    OUT_FEATURES = [128, 128]

    x = jax.random.normal(kx, (B, T, IN), dtype=jnp.float32)
    params = init_prenet_params(kp, IN, OUT_FEATURES)
    seed = jax.random.randint(ks, (), 0, 2**31 - 1, dtype=jnp.int32)

    y = prenet_forward(x, params, seed)
    jax.block_until_ready(y)

    assert y.shape == (B, T, OUT_FEATURES[-1]), y.shape
    assert y.dtype == jnp.float32
    assert bool(jnp.all(jnp.isfinite(y)))
    assert bool(jnp.all(y >= 0.0))          # relu -> {0, 2}-mask keeps y >= 0
    print("KERNEL_OK")
</pallas_src>

<mosaic_0001>
module attributes {stable_mosaic.version = 11 : i64} {
  func.func @_prenet2_kernel(%arg0: i32, %arg1: memref<1xi32, #tpu.memory_space<smem>>, %arg2: memref<16x32xf32, #tpu.memory_space<vmem>>, %arg3: memref<32x128xf32, #tpu.memory_space<vmem>>, %arg4: memref<1x128xf32, #tpu.memory_space<vmem>>, %arg5: memref<128x128xf32, #tpu.memory_space<vmem>>, %arg6: memref<1x128xf32, #tpu.memory_space<vmem>>, %arg7: memref<16x128xf32, #tpu.memory_space<vmem>>) attributes {dimension_semantics = [#tpu.dimension_semantics<parallel>], iteration_bounds = array<i64: 1>, scalar_prefetch = 1 : i64, scratch_operands = 0 : i64, tpu.core_type = #tpu.core_type<tc>, window_params = [{transform_indices = @transform_0, window_bounds = array<i64: 16, 32>}, {pipeline_mode = #tpu.pipeline_mode<synchronous>, transform_indices = @transform_1, window_bounds = array<i64: 32, 128>}, {pipeline_mode = #tpu.pipeline_mode<synchronous>, transform_indices = @transform_2, window_bounds = array<i64: 1, 128>}, {pipeline_mode = #tpu.pipeline_mode<synchronous>, transform_indices = @transform_3, window_bounds = array<i64: 128, 128>}, {pipeline_mode = #tpu.pipeline_mode<synchronous>, transform_indices = @transform_4, window_bounds = array<i64: 1, 128>}, {transform_indices = @transform_5, window_bounds = array<i64: 16, 128>}]} {
    %c0 = arith.constant 0 : index
    %0 = memref.load %arg1[%c0] : memref<1xi32, #tpu.memory_space<smem>>
    %c16_i32 = arith.constant 16 : i32
    %1 = arith.muli %arg0, %c16_i32 : i32
    %c0_0 = arith.constant 0 : index
    %c0_1 = arith.constant 0 : index
    %2 = vector.load %arg2[%c0_0, %c0_1] : memref<16x32xf32, #tpu.memory_space<vmem>>, vector<16x32xf32>
    %3 = arith.truncf %2 : vector<16x32xf32> to vector<16x32xbf16>
    %c0_2 = arith.constant 0 : index
    %c0_3 = arith.constant 0 : index
    %4 = vector.load %arg3[%c0_2, %c0_3] : memref<32x128xf32, #tpu.memory_space<vmem>>, vector<32x128xf32>
    %5 = arith.truncf %4 : vector<32x128xf32> to vector<32x128xbf16>
    %cst = arith.constant dense<0.000000e+00> : vector<16x128xf32>
    %6 = tpu.matmul %3, %5, %cst {dimension_numbers = #tpu.dot_dimension_numbers<[1], [0], [0], [1], [0, 0, 1, 1], [], []>} : vector<16x32xbf16>, vector<32x128xbf16>, vector<16x128xf32> -> vector<16x128xf32>
    %c0_4 = arith.constant 0 : index
    %c0_5 = arith.constant 0 : index
    %7 = vector.load %arg4[%c0_4, %c0_5] : memref<1x128xf32, #tpu.memory_space<vmem>>, vector<1x128xf32>
    %8 = vector.broadcast %7 : vector<1x128xf32> to vector<16x128xf32>
    %9 = arith.addf %6, %8 : vector<16x128xf32>
    %cst_6 = arith.constant 0.000000e+00 : f32
    %10 = vector.broadcast %cst_6 : f32 to vector<16x128xf32>
    %11 = arith.maximumf %9, %10 : vector<16x128xf32>
    %12 = tpu.iota {dimensions = array<i32: 0>} : vector<16x128xi32>
    %13 = tpu.iota {dimensions = array<i32: 1>} : vector<16x128xi32>
    %14 = vector.broadcast %1 : i32 to vector<16x128xi32>
    %15 = arith.addi %12, %14 : vector<16x128xi32>
    %c608135816_i32 = arith.constant 608135816 : i32
    %16 = arith.xori %0, %c608135816_i32 : i32
    %c-1640531527_i32 = arith.constant -1640531527 : i32
    %17 = vector.broadcast %c-1640531527_i32 : i32 to vector<16x128xi32>
    %18 = arith.muli %15, %17 : vector<16x128xi32>
    %19 = vector.broadcast %16 : i32 to vector<16x128xi32>
    %20 = arith.xori %19, %18 : vector<16x128xi32>
    %c-2048144789_i32 = arith.constant -2048144789 : i32
    %21 = vector.broadcast %c-2048144789_i32 : i32 to vector<16x128xi32>
    %22 = arith.muli %13, %21 : vector<16x128xi32>
    %23 = arith.xori %20, %22 : vector<16x128xi32>
    %c16_i32_7 = arith.constant 16 : i32
    %24 = vector.broadcast %c16_i32_7 : i32 to vector<16x128xi32>
    %25 = arith.shrui %23, %24 : vector<16x128xi32>
    %26 = arith.xori %23, %25 : vector<16x128xi32>
    %c2146121005_i32 = arith.constant 2146121005 : i32
    %27 = vector.broadcast %c2146121005_i32 : i32 to vector<16x128xi32>
    %28 = arith.muli %26, %27 : vector<16x128xi32>
    %c15_i32 = arith.constant 15 : i32
    %29 = vector.broadcast %c15_i32 : i32 to vector<16x128xi32>
    %30 = arith.shrui %28, %29 : vector<16x128xi32>
    %31 = arith.xori %28, %30 : vector<16x128xi32>
    %c-2073254261_i32 = arith.constant -2073254261 : i32
    %32 = vector.broadcast %c-2073254261_i32 : i32 to vector<16x128xi32>
    %33 = arith.muli %31, %32 : vector<16x128xi32>
    %c16_i32_8 = arith.constant 16 : i32
    %34 = vector.broadcast %c16_i32_8 : i32 to vector<16x128xi32>
    %35 = arith.shrui %33, %34 : vector<16x128xi32>
    %36 = arith.xori %33, %35 : vector<16x128xi32>
    %c-2147483648_i32 = arith.constant -2147483648 : i32
    %37 = vector.broadcast %c-2147483648_i32 : i32 to vector<16x128xi32>
    %38 = arith.cmpi uge, %36, %37 : vector<16x128xi32>
    %cst_9 = arith.constant 2.000000e+00 : f32
    %cst_10 = arith.constant 0.000000e+00 : f32
    %39 = vector.broadcast %cst_9 : f32 to vector<16x128xf32>
    %40 = vector.broadcast %cst_10 : f32 to vector<16x128xf32>
    %41 = arith.select %38, %39, %40 : vector<16x128xi1>, vector<16x128xf32>
    %42 = arith.mulf %11, %41 : vector<16x128xf32>
    %c0_11 = arith.constant 0 : index
    %c0_12 = arith.constant 0 : index
    %43 = vector.load %arg5[%c0_11, %c0_12] : memref<128x128xf32, #tpu.memory_space<vmem>>, vector<128x128xf32>
    %44 = arith.truncf %43 : vector<128x128xf32> to vector<128x128xbf16>
    %45 = arith.truncf %42 : vector<16x128xf32> to vector<16x128xbf16>
    %cst_13 = arith.constant dense<0.000000e+00> : vector<16x128xf32>
    %46 = tpu.matmul %45, %44, %cst_13 {dimension_numbers = #tpu.dot_dimension_numbers<[1], [0], [0], [1], [0, 0, 1, 1], [], []>} : vector<16x128xbf16>, vector<128x128xbf16>, vector<16x128xf32> -> vector<16x128xf32>
    %c0_14 = arith.constant 0 : index
    %c0_15 = arith.constant 0 : index
    %47 = vector.load %arg6[%c0_14, %c0_15] : memref<1x128xf32, #tpu.memory_space<vmem>>, vector<1x128xf32>
    %48 = vector.broadcast %47 : vector<1x128xf32> to vector<16x128xf32>
    %49 = arith.addf %46, %48 : vector<16x128xf32>
    %cst_16 = arith.constant 0.000000e+00 : f32
    %50 = vector.broadcast %cst_16 : f32 to vector<16x128xf32>
    %51 = arith.maximumf %49, %50 : vector<16x128xf32>
    %52 = tpu.iota {dimensions = array<i32: 0>} : vector<16x128xi32>
    %53 = tpu.iota {dimensions = array<i32: 1>} : vector<16x128xi32>
    %54 = vector.broadcast %1 : i32 to vector<16x128xi32>
    %55 = arith.addi %52, %54 : vector<16x128xi32>
    %c-1209970334_i32 = arith.constant -1209970334 : i32
    %56 = arith.xori %0, %c-1209970334_i32 : i32
    %c-1640531527_i32_17 = arith.constant -1640531527 : i32
    %57 = vector.broadcast %c-1640531527_i32_17 : i32 to vector<16x128xi32>
    %58 = arith.muli %55, %57 : vector<16x128xi32>
    %59 = vector.broadcast %56 : i32 to vector<16x128xi32>
    %60 = arith.xori %59, %58 : vector<16x128xi32>
    %c-2048144789_i32_18 = arith.constant -2048144789 : i32
    %61 = vector.broadcast %c-2048144789_i32_18 : i32 to vector<16x128xi32>
    %62 = arith.muli %53, %61 : vector<16x128xi32>
    %63 = arith.xori %60, %62 : vector<16x128xi32>
    %c16_i32_19 = arith.constant 16 : i32
    %64 = vector.broadcast %c16_i32_19 : i32 to vector<16x128xi32>
    %65 = arith.shrui %63, %64 : vector<16x128xi32>
    %66 = arith.xori %63, %65 : vector<16x128xi32>
    %c2146121005_i32_20 = arith.constant 2146121005 : i32
    %67 = vector.broadcast %c2146121005_i32_20 : i32 to vector<16x128xi32>
    %68 = arith.muli %66, %67 : vector<16x128xi32>
    %c15_i32_21 = arith.constant 15 : i32
    %69 = vector.broadcast %c15_i32_21 : i32 to vector<16x128xi32>
    %70 = arith.shrui %68, %69 : vector<16x128xi32>
    %71 = arith.xori %68, %70 : vector<16x128xi32>
    %c-2073254261_i32_22 = arith.constant -2073254261 : i32
    %72 = vector.broadcast %c-2073254261_i32_22 : i32 to vector<16x128xi32>
    %73 = arith.muli %71, %72 : vector<16x128xi32>
    %c16_i32_23 = arith.constant 16 : i32
    %74 = vector.broadcast %c16_i32_23 : i32 to vector<16x128xi32>
    %75 = arith.shrui %73, %74 : vector<16x128xi32>
    %76 = arith.xori %73, %75 : vector<16x128xi32>
    %c-2147483648_i32_24 = arith.constant -2147483648 : i32
    %77 = vector.broadcast %c-2147483648_i32_24 : i32 to vector<16x128xi32>
    %78 = arith.cmpi uge, %76, %77 : vector<16x128xi32>
    %cst_25 = arith.constant 2.000000e+00 : f32
    %cst_26 = arith.constant 0.000000e+00 : f32
    %79 = vector.broadcast %cst_25 : f32 to vector<16x128xf32>
    %80 = vector.broadcast %cst_26 : f32 to vector<16x128xf32>
    %81 = arith.select %78, %79, %80 : vector<16x128xi1>, vector<16x128xf32>
    %82 = arith.mulf %51, %81 : vector<16x128xf32>
    %c0_27 = arith.constant 0 : index
    %c0_28 = arith.constant 0 : index
    %83 = vector.load %arg7[%c0_27, %c0_28] : memref<16x128xf32, #tpu.memory_space<vmem>>, vector<16x128xf32>
    tpu.vector_store %arg7[%c0_27, %c0_28], %82 {strides = array<i32>} : memref<16x128xf32, #tpu.memory_space<vmem>>, vector<16x128xf32>,
    return
  }
  func.func @transform_0(%arg0: i32, %arg1: memref<1xi32, #tpu.memory_space<smem>>) -> (i32, i32) {
    %c0_i32 = arith.constant 0 : i32
    %c0_i32_0 = arith.constant 0 : i32
    return %arg0, %c0_i32 : i32, i32
  }
  func.func @transform_1(%arg0: i32, %arg1: memref<1xi32, #tpu.memory_space<smem>>) -> (i32, i32) {
    %c0_i32 = arith.constant 0 : i32
    %c0_i32_0 = arith.constant 0 : i32
    %c0_i32_1 = arith.constant 0 : i32
    return %c0_i32, %c0_i32_0 : i32, i32
  }
  func.func @transform_2(%arg0: i32, %arg1: memref<1xi32, #tpu.memory_space<smem>>) -> (i32, i32) {
    %c0_i32 = arith.constant 0 : i32
    %c0_i32_0 = arith.constant 0 : i32
    %c0_i32_1 = arith.constant 0 : i32
    return %c0_i32, %c0_i32_0 : i32, i32
  }
  func.func @transform_3(%arg0: i32, %arg1: memref<1xi32, #tpu.memory_space<smem>>) -> (i32, i32) {
    %c0_i32 = arith.constant 0 : i32
    %c0_i32_0 = arith.constant 0 : i32
    %c0_i32_1 = arith.constant 0 : i32
    return %c0_i32, %c0_i32_0 : i32, i32
  }
  func.func @transform_4(%arg0: i32, %arg1: memref<1xi32, #tpu.memory_space<smem>>) -> (i32, i32) {
    %c0_i32 = arith.constant 0 : i32
    %c0_i32_0 = arith.constant 0 : i32
    %c0_i32_1 = arith.constant 0 : i32
    return %c0_i32, %c0_i32_0 : i32, i32
  }
  func.func @transform_5(%arg0: i32, %arg1: memref<1xi32, #tpu.memory_space<smem>>) -> (i32, i32) {
    %c0_i32 = arith.constant 0 : i32
    %c0_i32_0 = arith.constant 0 : i32
    return %arg0, %c0_i32 : i32, i32
  }
}

</mosaic_0001>

<bundles_post_ra>
// kernel: prenet_forward.1
= control target key start
LH: loop header
LB: loop body
LE: loop exit
PB: predicated region body
PF: predicated region fallthrough
CT: control target
= control target key end

     0   :  { %12 = vsyncpa [#allocation5], 0  ;;  %s522_s0 = inlined_call_operand.<no memory space> [shape: s32[1], index: 0, kind: input, shape index: {}]   ;;  %s523_s1 = inlined_call_operand.vmem [shape: f32[16,32], index: 1, kind: input, shape index: {}]   ;;  %s524_s2 = inlined_call_operand.hbm [shape: f32[32,128], index: 2, kind: input, shape index: {}]   ;;  %s525_s3 = inlined_call_operand.vmem [shape: f32[1,128], index: 3, kind: input, shape index: {}]   ;;  %s526_s4 = inlined_call_operand.hbm [shape: f32[128,128], index: 4, kind: input, shape index: {}]   ;;  %s527_s5 = inlined_call_operand.vmem [shape: f32[1,128], index: 5, kind: input, shape index: {}]   ;;  %s528_s6 = inlined_call_operand.hbm [shape: f32[16,128], index: 6, kind: output, shape index: {}]  }
   0x1   :  { %13 = vsyncpa [#allocation8], 0 }
   0x2   :  { %14 = vsyncpa [#allocation6], 0  ;;  %s401_s21 = smov [#allocation4]   ;;  %s329_s25 = scalar_lea.hbm %s524_s2, 512 }
   0x3   :  { %s22_s22 = sshll.u32 %s401_s21, 4  ;;  %p330_p0 = scmp.ne.s32.totalorder %s524_s2, %s329_s25  ;;  %s23_s22 = int_to_ptr.vmem [resolvable:$true] %s22_s22 }
   0x4   :  { %p333_p1 = scmp.lt.u32.totalorder %s329_s25, %s524_s2 }
   0x6   :  { %p335_p2 = pnand %p333_p1, %p330_p0 }
   0x8   :  { %338 = shalt.err (!%p335_p2)
}
   0x9   :  { %s339_s30 = scalar_lea.vmem %s23_s22, 512  ;;  %p344_p4 = scmp.lt.s32.totalorder %s23_s22, %s23_s22 }
   0xa   :  { %p340_p3 = scmp.ne.s32.totalorder %s23_s22, %s339_s30  ;;  %p345_p5 = scmp.lt.s32.totalorder %s339_s30, %s339_s30 }
   0xc   :  { %p346_p6 = por %p345_p5, %p344_p4 }
   0xe   :  { %p347_p7 = pnand %p346_p6, %p340_p3 }
  0x10   :  { %350 = shalt.err (!%p347_p7)
}
  0x11   :  { %s402_s7 = smov 128   ;;  %s403_s8 = smov 8  }
  0x12   :  { %28 = dma.hbm_to_vmem [thread:$0]  %s524_s2, 512, %s23_s22, [#allocation5], %s402_s7, %s402_s7, %s403_s8  }
  0x13   :  { %s404_s11 = smov [#allocation7]   ;;  %s351_s15 = scalar_lea.hbm %s526_s4, 2048 }
  0x14   :  { %s36_s12 = sshll.u32 %s404_s11, 4  ;;  %p352_p8 = scmp.ne.s32.totalorder %s526_s4, %s351_s15  ;;  %s37_s12 = int_to_ptr.vmem [resolvable:$true] %s36_s12 }
  0x15   :  { %p355_p9 = scmp.lt.u32.totalorder %s351_s15, %s526_s4 }
  0x17   :  { %p357_p10 = pnand %p355_p9, %p352_p8 }
  0x19   :  { %360 = shalt.err (!%p357_p10)
}
  0x1a   :  { %s361_s20 = scalar_lea.vmem %s37_s12, 2048  ;;  %p366_p12 = scmp.lt.s32.totalorder %s37_s12, %s37_s12 }
  0x1b   :  { %p362_p11 = scmp.ne.s32.totalorder %s37_s12, %s361_s20  ;;  %p367_p13 = scmp.lt.s32.totalorder %s361_s20, %s361_s20 }
  0x1d   :  { %p368_p0 = por %p367_p13, %p366_p12 }
  0x1f   :  { %p369_p1 = pnand %p368_p0, %p362_p11 }
  0x21   :  { %372 = shalt.err (!%p369_p1)
}
  0x22   :  { %42 = dma.hbm_to_vmem [thread:$0]  %s526_s4, 2048, %s37_s12, [#allocation8], %s402_s7, %s402_s7, %s403_s8  }
  0x23   :  { %395 = dma.done.wait [#allocation5], 512  }
  0x24   :  { %396 = vsyncadd [#allocation5], 4294966784 }
  0x25   :  { %397 = dma.done.wait [#allocation8], 2048  }
  0x26   :  { %398 = vsyncadd [#allocation8], 4294965248  ;;  %v405_v0 = vmov 0.0   ;;  %vm406_vm0 = vmmov 0   ;;  %v57_v1 = vld [vmem:[#allocation4] sm:$0xff]  ;;  %v58_v2 = vld [vmem:[#allocation4 + $0x8] sm:$0xff]  ;;  %v117_v34 = vlaneseq }
  0x27   :  { %294 = vmatprep.subr.bf16.mxu0 %v405_v0  ;;  %298 = vmatprep.mubr.msk.bf16.mxu0 %vm406_vm0, %v405_v0  ;;  %v59_v3 = vld [vmem:[#allocation4 + $0x10] sm:$0xff]  ;;  %v61_v4 = vpack.c.bf16 %v58_v2, %v57_v1  ;;  %v60_v5 = vld [vmem:[#allocation4 + $0x18] sm:$0xff]  ;;  %v156_v6 = vld [vmem:[#allocation7] sm:$0xff]  ;;  %vm70_vm1 = vcmask 261120   ;;  %s125_s26 = sxor.u32 608135816, %s522_s0 }
  0x28   :  { %302 = vmatprep.subr.bf16.mxu1 %v405_v0  ;;  %318 = vmatprep.mubr.msk.bf16.mxu1 %vm406_vm0, %v405_v0  ;;  %v157_v7 = vld [vmem:[#allocation7 + $0x8] sm:$0xff]  ;;  %v158_v8 = vld [vmem:[#allocation7 + $0x10] sm:$0xff]  ;;  %v62_v9 = vpack.c.bf16 %v60_v5, %v59_v3  ;;  %v54_v10 = vld [vmem:[%s523_s1] sm:$0xff]  ;;  %v118_v35 = vshrl.u32 %v117_v34, 7  ;;  %v121_v37 = vand.u32 127, %v117_v34  ;;  %v128_v40 = vstv %s125_s26  ;;  %s407_s10 = smov [#allocation9]  }
  0x29   :  { %295 = vmatpush3.bf16.msra.mxu0 %v61_v4  ;;  %v55_v11 = vld [vmem:[%s523_s1 + $0x8] sm:$0xff]  ;;  %v172_v12 = vpack.c.bf16 %v157_v7, %v156_v6  ;;  %v159_v13 = vld [vmem:[#allocation7 + $0x18] sm:$0xff]  ;;  %v160_v16 = vld [vmem:[#allocation7 + $0x20] sm:$0xff]  ;;  %s231_s30 = sxor.u32 3084996962, %s522_s0  ;;  %s266_s11 = sshll.u32 %s407_s10, 4  ;;  %s267_s11 = int_to_ptr.vmem [resolvable:$true] %s266_s11 }
  0x2a   :  { %296 = vmatprep.subr.bf16.mxu0 %v405_v0  ;;  %v173_v14 = vpack.c.bf16 %v159_v13, %v158_v8  ;;  %v56_v15 = vpack.c.bf16 %v55_v11, %v54_v10  ;;  %v161_v17 = vld [vmem:[#allocation7 + $0x28] sm:$0xff]  ;;  %v162_v19 = vld [vmem:[#allocation7 + $0x30] sm:$0xff]  ;;  %v163_v20 = vld [vmem:[#allocation7 + $0x38] sm:$0xff]  ;;  %v119_v36 = vadd.s32 8, %v118_v35  ;;  %v126_v38 = vmul.u32 2654435769, %v118_v35  ;;  %p378_p3 = scmp.lt.s32.totalorder %s267_s11, %s267_s11 }
  0x2b   :  { %303 = vmatpush3.bf16.msra.mxu1 %v172_v12  ;;  %v174_v18 = vpack.c.bf16 %v161_v17, %v160_v16  ;;  %v175_v21 = vpack.c.bf16 %v163_v20, %v162_v19  ;;  %v164_v22 = vld [vmem:[#allocation7 + $0x40] sm:$0xff]  ;;  %v165_v23 = vld [vmem:[#allocation7 + $0x48] sm:$0xff]  ;;  %v166_v25 = vld [vmem:[#allocation7 + $0x50] sm:$0xff]  ;;  %v131_v42 = vmul.u32 2246822507, %v121_v37  ;;  %v232_v13 = vstv %s231_s30 }
  0x2c   :  { %304 = vmatprep.subr.bf16.mxu1 %v405_v0  ;;  %v176_v24 = vpack.c.bf16 %v165_v23, %v164_v22  ;;  %v167_v26 = vld [vmem:[#allocation7 + $0x58] sm:$0xff]  ;;  %v168_v28 = vld [vmem:[#allocation7 + $0x60] sm:$0xff]  ;;  %v169_v29 = vld [vmem:[#allocation7 + $0x68] sm:$0xff]  ;;  %v127_v39 = vmul.u32 2654435769, %v119_v36  ;;  %v129_v41 = vxor.u32 %v128_v40, %v126_v38 }
  0x2d   :  { %297 = vmatpush3.bf16.msra.mxu0 %v62_v9  ;;  %v177_v27 = vpack.c.bf16 %v167_v26, %v166_v25  ;;  %v178_v30 = vpack.c.bf16 %v169_v29, %v168_v28  ;;  %v170_v31 = vld [vmem:[#allocation7 + $0x70] sm:$0xff]  ;;  %v171_v32 = vld [vmem:[#allocation7 + $0x78] sm:$0xff]  ;;  %v279_v62 = vld [vmem:[%s525_s3] ss:$0 sm:$0xff] }
  0x2e   :  { %v179_v33 = vpack.c.bf16 %v171_v32, %v170_v31  ;;  %v130_v43 = vxor.u32 %v128_v40, %v127_v39  ;;  %v132_v44 = vxor.u32 %v131_v42, %v129_v41  ;;  %v281_v34 = vld [vmem:[%s527_s5] ss:$0 sm:$0xff]  ;;  %s373_s5 = scalar_lea.vmem %s267_s11, 256 }
  0x2f   :  { %305 = vmatpush3.bf16.msra.mxu1 %v173_v14  ;;  %v233_v14 = vxor.u32 %v232_v13, %v126_v38  ;;  %p374_p2 = scmp.ne.s32.totalorder %s267_s11, %s373_s5  ;;  %p379_p4 = scmp.lt.s32.totalorder %s373_s5, %s373_s5 }
  0x30   :  { %299 = vmatmul.mubr.msk.bf16.vlgmr.msra.gmra.mrb[0].mxu0 %vm70_vm1, %v56_v15  ;;  %306 = vmatprep.subr.bf16.mxu1 %v405_v0  ;;  %v133_v45 = vxor.u32 %v131_v42, %v130_v43  ;;  %v134_v46 = vshrl.u32 %v132_v44, 16  ;;  %v234_v15 = vxor.u32 %v232_v13, %v127_v39 }
  0x31   :  { %v235_v16 = vxor.u32 %v233_v14, %v131_v42  ;;  %p380_p5 = por %p379_p4, %p378_p3 }
  0x32   :  { %v135_v47 = vshrl.u32 %v133_v45, 16  ;;  %v136_v48 = vxor.u32 %v134_v46, %v132_v44  ;;  %v236_v17 = vxor.u32 %v234_v15, %v131_v42 }
  0x33   :  { %307 = vmatpush3.bf16.msra.mxu1 %v174_v18  ;;  %v237_v18 = vshrl.u32 %v235_v16, 16  ;;  %p381_p6 = pnand %p380_p5, %p374_p2 }
  0x34   :  { %308 = vmatprep.subr.bf16.mxu1 %v405_v0  ;;  %v137_v49 = vxor.u32 %v135_v47, %v133_v45  ;;  %v138_v50 = vmul.u32 2146121005, %v136_v48  ;;  %v238_v19 = vshrl.u32 %v236_v17, 16 }
  0x35   :  { %v239_v20 = vxor.u32 %v237_v18, %v235_v16 }
  0x36   :  { %v139_v51 = vmul.u32 2146121005, %v137_v49  ;;  %v140_v52 = vshrl.u32 %v138_v50, 15 }
  0x37   :  { %309 = vmatpush3.bf16.msra.mxu1 %v175_v21  ;;  %v240_v21 = vxor.u32 %v238_v19, %v236_v17  ;;  %v241_v22 = vmul.u32 2146121005, %v239_v20 }
  0x38   :  { %310 = vmatprep.subr.bf16.mxu1 %v405_v0  ;;  %v141_v53 = vshrl.u32 %v139_v51, 15  ;;  %v142_v54 = vxor.u32 %v140_v52, %v138_v50 }
  0x39   :  { %v242_v23 = vmul.u32 2146121005, %v240_v21 }
  0x3a   :  { %v143_v55 = vxor.u32 %v141_v53, %v139_v51  ;;  %v144_v56 = vmul.u32 2221713035, %v142_v54 }
  0x3b   :  { %311 = vmatpush3.bf16.msra.mxu1 %v176_v24  ;;  %v243_v24 = vshrl.u32 %v241_v22, 15  ;;  %v244_v25 = vshrl.u32 %v242_v23, 15 }
  0x3c   :  { %312 = vmatprep.subr.bf16.mxu1 %v405_v0  ;;  %v145_v57 = vmul.u32 2221713035, %v143_v55  ;;  %v146_v58 = vshrl.u32 %v144_v56, 16 }
  0x3d   :  { %v245_v26 = vxor.u32 %v243_v24, %v241_v22 }
  0x3e   :  { %v147_v59 = vshrl.u32 %v145_v57, 16  ;;  %v148_v60 = vxor.u32 %v146_v58, %v144_v56 }
  0x3f   :  { %313 = vmatpush3.bf16.msra.mxu1 %v177_v27  ;;  %v246_v27 = vxor.u32 %v244_v25, %v242_v23  ;;  %v247_v28 = vmul.u32 2221713035, %v245_v26 }
  0x40   :  { %314 = vmatprep.subr.bf16.mxu1 %v405_v0  ;;  %v149_v61 = vxor.u32 %v147_v59, %v145_v57  ;;  %vm150_vm2 = vcmp.ge.u32.totalorder %v148_v60, 2147483648 }
  0x41   :  { %v152_v7 = vsel %vm150_vm2, 2.0, %v405_v0  ;;  %v248_v29 = vmul.u32 2221713035, %v246_v27 }
  0x42   :  { %vm151_vm3 = vcmp.ge.u32.totalorder %v149_v61, 2147483648 }
  0x43   :  { %315 = vmatpush3.bf16.msra.mxu1 %v178_v30  ;;  %v153_v8 = vsel %vm151_vm3, 2.0, %v405_v0  ;;  %v249_v30 = vshrl.u32 %v247_v28, 16  ;;  %v250_v31 = vshrl.u32 %v248_v29, 16 }
  0x44   :  { %316 = vmatprep.subr.bf16.mxu1 %v405_v0 }
  0x45   :  { %v251_v32 = vxor.u32 %v249_v30, %v247_v28 }
  0x47   :  { %317 = vmatpush3.bf16.msra.mxu1 %v179_v33  ;;  %v252_v33 = vxor.u32 %v250_v31, %v248_v29  ;;  %vm253_vm4 = vcmp.ge.u32.totalorder %v251_v32, 2147483648 }
  0x48   :  { %v255_v38 = vsel %vm253_vm4, 2.0, %v405_v0 }
  0x49   :  { %vm254_vm5 = vcmp.ge.u32.totalorder %v252_v33, 2147483648 }
  0x4a   :  { %v256_v43 = vsel %vm254_vm5, 2.0, %v405_v0 }
 0x103   :  { %v108_v63 = vpop.f32.mrb[0].mxu0 }
 0x104   :  { %v109_v1 = vadd.f32 %v279_v62, %v108_v63  ;;  %v300_v2 = vpop.f32.mrb[1].mxu0 }
 0x105   :  { %v111_v3 = vpop.f32.mrb[2].mxu0 }
 0x106   :  { %v115_v4 = vmax.f32 %v109_v1, 0.0  ;;  %v112_v5 = vadd.f32 %v279_v62, %v111_v3  ;;  %v301_v6 = vpop.f32.mrb[3].mxu0 }
 0x108   :  { %v116_v9 = vmax.f32 %v112_v5, 0.0  ;;  %v154_v10 = vmul.f32 %v152_v7, %v115_v4 }
 0x10a   :  { %v155_v11 = vmul.f32 %v153_v8, %v116_v9 }
 0x10c   :  { %v180_v12 = vpack.c.bf16 %v155_v11, %v154_v10 }
 0x10e   :  { %319 = vmatmul.mubr.bf16.vlgmr.msra.gmra.mrb[0].mxu1 %v180_v12 }
 0x1e1   :  { %v222_v35 = vpop.f32.mrb[0].mxu1 }
 0x1e2   :  { %v223_v36 = vadd.f32 %v281_v34, %v222_v35  ;;  %v320_v37 = vpop.f32.mrb[1].mxu1 }
 0x1e3   :  { %v225_v39 = vpop.f32.mrb[2].mxu1 }
 0x1e4   :  { %v229_v40 = vmax.f32 %v223_v36, 0.0  ;;  %v226_v41 = vadd.f32 %v281_v34, %v225_v39  ;;  %v321_v42 = vpop.f32.mrb[3].mxu1 }
 0x1e6   :  { %v257_v44 = vmul.f32 %v255_v38, %v229_v40  ;;  %v230_v45 = vmax.f32 %v226_v41, 0.0 }
 0x1e8   :  { %259 = vst [vmem:[#allocation9] sm:$0xff] %v257_v44  ;;  %v258_v46 = vmul.f32 %v256_v43, %v230_v45 }
 0x1ea   :  { %260 = vst [vmem:[#allocation9 + $0x8] sm:$0xff] %v258_v46 }
 0x1eb   :  { %384 = shalt.err (!%p381_p6)
}
 0x1ec   :  { %s385_s14 = scalar_lea.hbm %s528_s6, 256 }
 0x1ed   :  { %p386_p7 = scmp.ne.s32.totalorder %s528_s6, %s385_s14  ;;  %p389_p8 = scmp.lt.u32.totalorder %s385_s14, %s528_s6 }
 0x1ef   :  { %p391_p9 = pnand %p389_p8, %p386_p7 }
 0x1f1   :  { %394 = shalt.err (!%p391_p9)
}
 0x1f2   :  { %272 = dma.vmem_to_hbm [thread:$0]  %s267_s11, 256, %s528_s6, [#allocation6], %s402_s7, %s402_s7, %s403_s8  }
 0x1f3   :  { %399 = dma.done.wait [#allocation6], 256  }
 0x1f4   :  { %400 = vsyncadd [#allocation6], 4294967040 }
 0x1f5   :  { %276 = vsyncpa [#allocation5], 1 }
 0x1f6   :  { %277 = vsyncpa [#allocation8], 1 }
 0x1f7   :  { %278 = vsyncpa [#allocation6], 1 }

</bundles_post_ra>
